<compile_context>
chip_gen: v5e
topology: v5e:2x2
jax: 0.10.0
libtpu: 0.0.40
codegen_flags: <defaults>
</compile_context>

<pallas_src>
import jax
import jax.numpy as jnp
from jax.experimental import pallas as pl
from jax.experimental.pallas import tpu as pltpu


def _identity_kernel(x_ref, o_ref):
    # Pure pass-through: copy the VMEM tile unchanged.
    o_ref[...] = x_ref[...]


def _sublane_multiple(dtype) -> int:
    """Native sublane packing: 8 rows (4-byte), 16 (2-byte), 32 (1-byte)."""
    itemsize = jnp.dtype(dtype).itemsize
    return max(8, 32 // max(itemsize, 1))


def _flatten_lane_dense(x: jax.Array) -> jax.Array:
    """Reshape to 2D with the widest multiple-of-128 last dim that divides
    the total size; fall back to the original last dim otherwise."""
    total = x.size
    for c in (8192, 4096, 2048, 1024, 512, 256, 128):
        if total % c == 0:
            return x.reshape(total // c, c)
    # Fallback (total not a multiple of 128): keep last dim lane-mapped.
    if x.ndim == 0:
        return x.reshape(1, 1)
    if x.ndim == 1:
        return x.reshape(1, total)
    return x.reshape(-1, x.shape[-1])


# ~4 MiB per tile: 2 input + 2 output double-buffers ~= 16 MiB, which fits the
# explicit 32 MiB scoped-VMEM limit below on v5e / v6e / v7x alike.
_TILE_BYTES = 4 * 1024 * 1024
_VMEM_LIMIT_BYTES = 32 * 1024 * 1024


def identity(x: jax.Array, *, donate: bool = False) -> jax.Array:
    """Pallas implementation of nn.Identity: returns input unchanged."""
    if x.size == 0:
        return x

    orig_shape = x.shape
    dtype = x.dtype

    x2 = _flatten_lane_dense(x)
    R, C = x2.shape

    # Pick the row-tile so one block is ~_TILE_BYTES, rounded to the native
    # sublane packing of the dtype; full-extent blocks for small inputs.
    itemsize = jnp.dtype(dtype).itemsize
    row_bytes = C * itemsize
    sub = _sublane_multiple(dtype)
    tr = max(1, _TILE_BYTES // row_bytes)
    tr = max(sub, (tr // sub) * sub)
    if tr >= R:
        tr = R            # whole array in one block (full extents are legal)
        grid = (1,)
    else:
        grid = (pl.cdiv(R, tr),)

    kwargs = {}
    if donate:
        # Output buffer reuses the donated input buffer (no second HBM alloc).
        # Only safe when the caller no longer needs the input array.
        kwargs["input_output_aliases"] = {0: 0}

    out = pl.pallas_call(
        _identity_kernel,
        out_shape=jax.ShapeDtypeStruct((R, C), dtype),
        grid=grid,
        in_specs=[pl.BlockSpec((tr, C), lambda i: (i, 0))],
        out_specs=pl.BlockSpec((tr, C), lambda i: (i, 0)),
        compiler_params=pltpu.CompilerParams(
            dimension_semantics=("parallel",),
            vmem_limit_bytes=_VMEM_LIMIT_BYTES,
        ),
        **kwargs,
    )(x2)

    return out.reshape(orig_shape)


if __name__ == "__main__":
    key = jax.random.PRNGKey(0)
    # NCHW input consistent with typical conv-module usage.
    x = jax.random.normal(key, (2, 4, 16, 16), dtype=jnp.float32)

    y = identity(x)
    jax.block_until_ready(y)

    assert y.shape == x.shape
    assert y.dtype == x.dtype
    assert bool(jnp.all(y == x))

    print("KERNEL_OK")
</pallas_src>

<mosaic_0001>
module attributes {stable_mosaic.version = 11 : i64} {
  func.func @_identity_kernel(%arg0: i32, %arg1: memref<1x2048xf32, #tpu.memory_space<vmem>>, %arg2: memref<1x2048xf32, #tpu.memory_space<vmem>>) attributes {dimension_semantics = [#tpu.dimension_semantics<parallel>], iteration_bounds = array<i64: 1>, scalar_prefetch = 0 : i64, scratch_operands = 0 : i64, tpu.core_type = #tpu.core_type<tc>, window_params = [{transform_indices = @transform_0, window_bounds = array<i64: 1, 2048>}, {transform_indices = @transform_1, window_bounds = array<i64: 1, 2048>}]} {
    %c0 = arith.constant 0 : index
    %c0_0 = arith.constant 0 : index
    %0 = vector.load %arg1[%c0, %c0_0] : memref<1x2048xf32, #tpu.memory_space<vmem>>, vector<1x2048xf32>
    %c0_1 = arith.constant 0 : index
    %c0_2 = arith.constant 0 : index
    %1 = vector.load %arg2[%c0_1, %c0_2] : memref<1x2048xf32, #tpu.memory_space<vmem>>, vector<1x2048xf32>
    tpu.vector_store %arg2[%c0_1, %c0_2], %0 {strides = array<i32>} : memref<1x2048xf32, #tpu.memory_space<vmem>>, vector<1x2048xf32>,
    return
  }
  func.func @transform_0(%arg0: i32) -> (i32, i32) {
    %c0_i32 = arith.constant 0 : i32
    %c0_i32_0 = arith.constant 0 : i32
    return %arg0, %c0_i32 : i32, i32
  }
  func.func @transform_1(%arg0: i32) -> (i32, i32) {
    %c0_i32 = arith.constant 0 : i32
    %c0_i32_0 = arith.constant 0 : i32
    return %arg0, %c0_i32 : i32, i32
  }
}

</mosaic_0001>

<bundles_post_ra>
// kernel: tpu_custom_call.1
= control target key start
LH: loop header
LB: loop body
LE: loop exit
PB: predicated region body
PF: predicated region fallthrough
CT: control target
= control target key end

     0   :  { %6 = vsyncpa [#allocation3], 0  ;;  %s116_s0 = inlined_call_operand.hbm [shape: f32[1,2048], index: 0, kind: input, shape index: {}]   ;;  %s117_s1 = inlined_call_operand.hbm [shape: f32[1,2048], index: 1, kind: output, shape index: {}]  }
   0x1   :  { %7 = vsyncpa [#allocation4], 0  ;;  %s13_s8 = sshll.u32 %s116_s0, 4  ;;  %s98_s9 = smov [#allocation2]   ;;  %s14_s8 = int_to_ptr.hbm [resolvable:$true] %s13_s8 }
   0x2   :  { %s15_s10 = sshll.u32 %s98_s9, 4  ;;  %s16_s10 = int_to_ptr.vmem [resolvable:$true] %s15_s10 }
   0x3   :  { %18 = dma.hbm_to_vmem [thread:$0]  %s14_s8, 256, %s16_s10, [#allocation3]  }
   0x4   :  { %94 = dma.done.wait [#allocation3], 256  }
   0x5   :  { %95 = vsyncadd [#allocation3], 4294967040  ;;  %s99_s11 = smov [#allocation5]   ;;  %s34_s15 = sshll.u32 %s117_s1, 4  ;;  %v23_v0 = vld [vmem:[#allocation2] sm:$0xff]  ;;  %v24_v1 = vld [vmem:[#allocation2 + $0x8] sm:$0xff]  ;;  %s35_s15 = int_to_ptr.hbm [resolvable:$true] %s34_s15 }
   0x6   :  { %s32_s12 = sshll.u32 %s99_s11, 4  ;;  %25 = vst [vmem:[#allocation5] sm:$0xff] %v23_v0  ;;  %s33_s12 = int_to_ptr.vmem [resolvable:$true] %s32_s12 }
   0x7   :  { %26 = vst [vmem:[#allocation5 + $0x8] sm:$0xff] %v24_v1 }
   0x8   :  { %37 = dma.vmem_to_hbm [thread:$0]  %s33_s12, 256, %s35_s15, [#allocation4]  }
   0x9   :  { %96 = dma.done.wait [#allocation4], 256  }
   0xa   :  { %97 = vsyncadd [#allocation4], 4294967040 }
   0xb   :  { %42 = vsyncpa [#allocation3], 1 }
   0xc   :  { %43 = vsyncpa [#allocation4], 1 }

</bundles_post_ra>
